<compile_context>
chip_gen: v5e
topology: v5e:2x2
jax: 0.10.0
libtpu: 0.0.40
codegen_flags: <defaults>
</compile_context>

<pallas_src>
import jax
import jax.numpy as jnp
from jax import lax
from jax.experimental import pallas as pl
from jax.experimental.pallas import tpu as pltpu


def _round_up(a, b):
    return ((a + b - 1) // b) * b


def _squared_exp_kernel(neg2l_ref, x_ref, yt_ref, lxx_ref, lyy_ref, o_ref):
    # neg2l = -2 * l lives in SMEM as a (1,) scalar.
    neg2l = neg2l_ref[0]

    # Gram tile on the MXU: contract x axis 1 with y^T axis 0 (no transpose),
    # f32 accumulation regardless of the input dtype.
    g = lax.dot_general(
        x_ref[...],                      # (TN, D)
        yt_ref[...],                     # (D, TM)
        dimension_numbers=(((1,), (0,)), ((), ())),
        preferred_element_type=jnp.float32,
    )                                    # (TN, TM)

    # k = l*(xx + yy - 2*g) = g*(-2l) + l*xx + l*yy  (row terms pre-scaled).
    k = g * neg2l + lxx_ref[...] + lyy_ref[...]
    # Cancellation guard: an RBF kernel value can never exceed 1, but the
    # expanded form can yield k slightly > 0 when x_i ~= y_j.
    k = jnp.minimum(k, 0.0)
    o_ref[...] = jnp.exp(k).astype(o_ref.dtype)


def squared_exp(x, y, sigma, *, tile_n=256, tile_m=1024,
                out_dtype=jnp.float32, mxu_dtype=jnp.float32):
    """Squared-exponential kernel matrix exp(-||x_i - y_j||^2 / (2 sigma^2)).

    out_dtype: dtype of the returned (N, M) matrix (bf16 halves HBM writeback).
    mxu_dtype: dtype fed to the MXU for x / y^T (bf16 halves the input DMA).
    """
    N, D = x.shape
    M, Dy = y.shape
    assert D == Dy, "x and y must share the feature dimension"

    x = x.astype(jnp.float32)
    y = y.astype(jnp.float32)
    sigma = jnp.asarray(sigma, dtype=jnp.float32)
    l = -0.5 / (sigma * sigma)

    # One-time wrapper work (tiny vs the N*M output): pre-scaled row norms in
    # f32 and the transposed y slab (lane-dense RHS for the MXU).
    lxx = l * jnp.sum(x * x, axis=1, keepdims=True)            # (N, 1) f32
    lyy = (l * jnp.sum(y * y, axis=1))[None, :]                 # (1, M) f32
    x_mxu = x.astype(mxu_dtype)                                 # (N, D)
    yt = y.T.astype(mxu_dtype)                                  # (D, M)
    neg2l = (-2.0 * l).reshape(1)                               # SMEM scalar

    # ---- tile selection --------------------------------------------------
    tile_n = min(tile_n, _round_up(N, 8))
    tile_m = min(tile_m, _round_up(M, 128))

    grid = (pl.cdiv(N, tile_n), pl.cdiv(M, tile_m))
    N_pad = grid[0] * tile_n
    M_pad = grid[1] * tile_m

    # Zero-pad the (cheap, O(N*D)/O(M*D)) inputs so every MXU input block is
    # full.  The OUTPUT stays un-padded: Pallas masks the ragged edge stores,
    # so no post-call slice/copy of the N*M result is needed.
    if N_pad != N:
        x_mxu = jnp.pad(x_mxu, ((0, N_pad - N), (0, 0)))
        lxx = jnp.pad(lxx, ((0, N_pad - N), (0, 0)))
    if M_pad != M:
        yt = jnp.pad(yt, ((0, 0), (0, M_pad - M)))
        lyy = jnp.pad(lyy, ((0, 0), (0, M_pad - M)))

    in_bytes = jnp.dtype(mxu_dtype).itemsize
    out_bytes = jnp.dtype(out_dtype).itemsize

    # Double-buffered VMEM estimate with (8,128) lane/sublane padding of each
    # block, plus headroom; clamped to stay valid on v7x (64 MiB physical) as
    # well as v5e/v6e (128 MiB).
    x_blk = tile_n * _round_up(D, 128) * in_bytes
    yt_blk = _round_up(D, 8) * tile_m * in_bytes
    lxx_blk = tile_n * 128 * 4
    lyy_blk = 8 * tile_m * 4
    out_blk = tile_n * tile_m * out_bytes
    vmem_need = 2 * (x_blk + yt_blk + lxx_blk + lyy_blk + out_blk) + (2 << 20)
    vmem_limit = int(min(max(vmem_need, 16 << 20), 48 << 20))

    cost = pl.CostEstimate(
        flops=2 * N * M * D,
        transcendentals=N * M,
        bytes_accessed=in_bytes * (N * D + D * M) + 4 * (N + M)
                       + out_bytes * N * M,
    )

    out = pl.pallas_call(
        _squared_exp_kernel,
        out_shape=jax.ShapeDtypeStruct((N, M), out_dtype),
        grid_spec=pltpu.PrefetchScalarGridSpec(
            num_scalar_prefetch=0,
            grid=grid,
            in_specs=[
                # -2*l: tiny scalar in SMEM, shared by every grid cell.
                pl.BlockSpec(memory_space=pltpu.MemorySpace.SMEM),
                # x: (TN, D) slab, varies with the row-tile index only
                # (j is the fastest grid axis, so this block is reused).
                pl.BlockSpec((tile_n, D), lambda i, j: (i, 0)),
                # y^T: (D, TM) slab, varies with the column-tile index only.
                pl.BlockSpec((D, tile_m), lambda i, j: (0, j)),
                # l * ||x_i||^2 : (TN, 1)
                pl.BlockSpec((tile_n, 1), lambda i, j: (i, 0)),
                # l * ||y_j||^2 : (1, TM)
                pl.BlockSpec((1, tile_m), lambda i, j: (0, j)),
            ],
            out_specs=pl.BlockSpec((tile_n, tile_m), lambda i, j: (i, j)),
        ),
        compiler_params=pltpu.CompilerParams(
            dimension_semantics=("parallel", "parallel"),
            vmem_limit_bytes=vmem_limit,
        ),
        cost_estimate=cost,
    )(neg2l, x_mxu, yt, lxx, lyy)

    return out


def squared_exp_ref(x, y, sigma):
    l = -0.5 / (sigma ** 2)
    xx = jnp.sum(x * x, axis=1)[:, None]
    yy = jnp.sum(y * y, axis=1)[None, :]
    k = -2.0 * (x @ y.T) + xx + yy
    return jnp.exp(k * l)


if __name__ == "__main__":
    key = jax.random.PRNGKey(0)
    kx, ky = jax.random.split(key)
    # Non-tile-multiple shapes to exercise the masked ragged-edge stores.
    N, M, D = 200, 96, 32
    x = jax.random.normal(kx, (N, D), dtype=jnp.float32)
    y = jax.random.normal(ky, (M, D), dtype=jnp.float32)

    # 1) sigma=1.0: kernel values spread over (0, 1], full f32 path.
    sigma1 = jnp.float32(1.0)
    out1 = jax.block_until_ready(squared_exp(x, y, sigma1))
    ref1 = squared_exp_ref(x, y, sigma1)
    assert out1.shape == (N, M)
    assert jnp.allclose(out1, ref1, atol=1e-4, rtol=1e-4), "mismatch (sigma=1.0)"

    # 2) module-default sigma=0.1 (nn.Parameter(torch.tensor(0.1))) with
    #    scaled inputs so the exp path is exercised without full underflow.
    sigma2 = jnp.float32(0.1)
    x2, y2 = 0.05 * x, 0.05 * y
    out2 = jax.block_until_ready(squared_exp(x2, y2, sigma2))
    ref2 = squared_exp_ref(x2, y2, sigma2)
    assert jnp.allclose(out2, ref2, atol=1e-4, rtol=1e-4), "mismatch (sigma=0.1)"

    # 3) low-precision fast path: bf16 MXU inputs + bf16 output writeback.
    out3 = jax.block_until_ready(
        squared_exp(x, y, sigma1, out_dtype=jnp.bfloat16, mxu_dtype=jnp.bfloat16))
    assert out3.dtype == jnp.bfloat16 and out3.shape == (N, M)
    assert jnp.allclose(out3.astype(jnp.float32), ref1, atol=8e-2, rtol=8e-2), \
        "mismatch (bf16 path)"

    print("KERNEL_OK")
</pallas_src>

<mosaic_0001>
module attributes {stable_mosaic.version = 11 : i64} {
  func.func @_squared_exp_kernel(%arg0: i32, %arg1: i32, %arg2: memref<1xf32, #tpu.memory_space<smem>>, %arg3: memref<200x32xf32, #tpu.memory_space<vmem>>, %arg4: memref<32x128xf32, #tpu.memory_space<vmem>>, %arg5: memref<200x1xf32, #tpu.memory_space<vmem>>, %arg6: memref<1x128xf32, #tpu.memory_space<vmem>>, %arg7: memref<200x128xf32, #tpu.memory_space<vmem>>) attributes {dimension_semantics = [#tpu.dimension_semantics<parallel>, #tpu.dimension_semantics<parallel>], iteration_bounds = array<i64: 1, 1>, scalar_prefetch = 0 : i64, scratch_operands = 0 : i64, tpu.core_type = #tpu.core_type<tc>, window_params = [{transform_indices = @transform_0, window_bounds = array<i64: 1>}, {transform_indices = @transform_1, window_bounds = array<i64: 200, 32>}, {transform_indices = @transform_2, window_bounds = array<i64: 32, 128>}, {transform_indices = @transform_3, window_bounds = array<i64: 200, 1>}, {transform_indices = @transform_4, window_bounds = array<i64: 1, 128>}, {transform_indices = @transform_5, window_bounds = array<i64: 200, 128>}]} {
    %c0 = arith.constant 0 : index
    %0 = memref.load %arg2[%c0] : memref<1xf32, #tpu.memory_space<smem>>
    %c0_0 = arith.constant 0 : index
    %c0_1 = arith.constant 0 : index
    %1 = vector.load %arg3[%c0_0, %c0_1] : memref<200x32xf32, #tpu.memory_space<vmem>>, vector<200x32xf32>
    %c0_2 = arith.constant 0 : index
    %c0_3 = arith.constant 0 : index
    %2 = vector.load %arg4[%c0_2, %c0_3] : memref<32x128xf32, #tpu.memory_space<vmem>>, vector<32x128xf32>
    %cst = arith.constant dense<0.000000e+00> : vector<200x128xf32>
    %3 = tpu.matmul %1, %2, %cst {dimension_numbers = #tpu.dot_dimension_numbers<[1], [0], [0], [1], [0, 0, 1, 1], [], []>} : vector<200x32xf32>, vector<32x128xf32>, vector<200x128xf32> -> vector<200x128xf32>
    %4 = vector.broadcast %0 : f32 to vector<200x128xf32>
    %5 = arith.mulf %3, %4 : vector<200x128xf32>
    %c0_4 = arith.constant 0 : index
    %c0_5 = arith.constant 0 : index
    %6 = vector.load %arg5[%c0_4, %c0_5] : memref<200x1xf32, #tpu.memory_space<vmem>>, vector<200x1xf32>
    %7 = vector.broadcast %6 : vector<200x1xf32> to vector<200x128xf32>
    %8 = arith.addf %5, %7 : vector<200x128xf32>
    %c0_6 = arith.constant 0 : index
    %c0_7 = arith.constant 0 : index
    %9 = vector.load %arg6[%c0_6, %c0_7] : memref<1x128xf32, #tpu.memory_space<vmem>>, vector<1x128xf32>
    %10 = vector.broadcast %9 : vector<1x128xf32> to vector<200x128xf32>
    %11 = arith.addf %8, %10 : vector<200x128xf32>
    %cst_8 = arith.constant 0.000000e+00 : f32
    %12 = vector.broadcast %cst_8 : f32 to vector<200x128xf32>
    %13 = arith.minimumf %11, %12 : vector<200x128xf32>
    %14 = math.exp %13 : vector<200x128xf32>
    %c0_9 = arith.constant 0 : index
    %c0_10 = arith.constant 0 : index
    %15 = vector.load %arg7[%c0_9, %c0_10] : memref<200x128xf32, #tpu.memory_space<vmem>>, vector<200x128xf32>
    tpu.vector_store %arg7[%c0_9, %c0_10], %14 {strides = array<i32>} : memref<200x128xf32, #tpu.memory_space<vmem>>, vector<200x128xf32>,
    return
  }
  func.func @transform_0(%arg0: i32, %arg1: i32) -> i32 {
    %c0_i32 = arith.constant 0 : i32
    %c0_i32_0 = arith.constant 0 : i32
    return %c0_i32 : i32
  }
  func.func @transform_1(%arg0: i32, %arg1: i32) -> (i32, i32) {
    %c0_i32 = arith.constant 0 : i32
    %c0_i32_0 = arith.constant 0 : i32
    return %arg0, %c0_i32 : i32, i32
  }
  func.func @transform_2(%arg0: i32, %arg1: i32) -> (i32, i32) {
    %c0_i32 = arith.constant 0 : i32
    %c0_i32_0 = arith.constant 0 : i32
    return %c0_i32, %arg1 : i32, i32
  }
  func.func @transform_3(%arg0: i32, %arg1: i32) -> (i32, i32) {
    %c0_i32 = arith.constant 0 : i32
    %c0_i32_0 = arith.constant 0 : i32
    return %arg0, %c0_i32 : i32, i32
  }
  func.func @transform_4(%arg0: i32, %arg1: i32) -> (i32, i32) {
    %c0_i32 = arith.constant 0 : i32
    %c0_i32_0 = arith.constant 0 : i32
    return %c0_i32, %arg1 : i32, i32
  }
  func.func @transform_5(%arg0: i32, %arg1: i32) -> (i32, i32) {
    %c0_i32 = arith.constant 0 : i32
    return %arg0, %arg1 : i32, i32
  }
}

</mosaic_0001>

<bundles_post_ra>
// kernel: tpu_custom_call.1
= control target key start
LH: loop header
LB: loop body
LE: loop exit
PB: predicated region body
PF: predicated region fallthrough
CT: control target
= control target key end

     0   :  { %v645_v0 = vmov 0   ;;  %vm51_vm0 = vcmask 261120   ;;  %s1037_s3 = inlined_call_operand.vmem [shape: f32[200,1], index: 3, kind: input, shape index: {}]   ;;  %s1038_s2 = inlined_call_operand.vmem [shape: f32[32,128], index: 2, kind: input, shape index: {}]   ;;  %s1039_s1 = inlined_call_operand.vmem [shape: f32[200,32], index: 1, kind: input, shape index: {}]   ;;  %s1040_s4 = inlined_call_operand.vmem [shape: f32[1,128], index: 4, kind: input, shape index: {}]   ;;  %s1041_s0 = inlined_call_operand.<no memory space> [shape: f32[1], index: 0, kind: input, shape index: {}]   ;;  %s1042_s5 = inlined_call_operand.vmem [shape: f32[200,96], index: 5, kind: output, shape index: {}]  }
   0x1   :  { %593 = vset.pattern.permute.xlu2 %v645_v0  ;;  %592 = vset.pattern.permute.xlu1 %v645_v0  ;;  %v249_v1 = vld [vmem:[%s1037_s3 + $0x20] sm:$0xff]  ;;  %v247_v2 = vld [vmem:[%s1037_s3 + $0x10] sm:$0xff]  ;;  %v50_v4 = vld [vmem:[%s1038_s2 + $0x18] sm:$0xff] }
   0x2   :  { %v245_v3 = vld [vmem:[%s1037_s3] sm:$0xff]  ;;  %591 = vset.pattern.permute.xlu0 %v645_v0  ;;  %292 = vperm.xlu2 %593, %v249_v1   ;;  %v49_v5 = vld [vmem:[%s1038_s2 + $0x10] sm:$0xff]  ;;  %v48_v6 = vld [vmem:[%s1038_s2 + $0x8] sm:$0xff]  ;;  %v880_v0 = vstv %s1041_s0 }
   0x3   :  { %282 = vperm.xlu1 %592, %v247_v2   ;;  %272 = vperm.xlu0 %591, %v245_v3   ;;  %v47_v7 = vld [vmem:[%s1038_s2] sm:$0xff]  ;;  %v28_v9 = vld [vmem:[%s1039_s1 + $0x30] sm:$0xff]  ;;  %v41_v11 = vld [vmem:[%s1039_s1 + $0x98] sm:$0xff] }
   0x4   :  { %139 = vmatpush.msra.mxu0 %v50_v4  ;;  %578 = vmatpush.msra.mxu1 %v50_v4  ;;  %v22_v8 = vld [vmem:[%s1039_s1] sm:$0xff]  ;;  %v250_v12 = vld [vmem:[%s1037_s3 + $0x28] sm:$0xff]  ;;  %v248_v13 = vld [vmem:[%s1037_s3 + $0x18] sm:$0xff] }
   0x5   :  { %579 = vmatpush.msra.mxu2 %v50_v4  ;;  %580 = vmatpush.msra.mxu3 %v50_v4  ;;  %v34_v10 = vld [vmem:[%s1039_s1 + $0x60] sm:$0xff]  ;;  %v246_v14 = vld [vmem:[%s1037_s3 + $0x8] sm:$0xff]  ;;  %v29_v16 = vld [vmem:[%s1039_s1 + $0x38] sm:$0xff] }
   0x6   :  { %140 = vmatpush.msra.mxu0 %v49_v5  ;;  %581 = vmatpush.msra.mxu1 %v49_v5  ;;  %v23_v15 = vld [vmem:[%s1039_s1 + $0x8] sm:$0xff]  ;;  %v42_v18 = vld [vmem:[%s1039_s1 + $0xa0] sm:$0xff]  ;;  %v252_v20 = vld [vmem:[%s1037_s3 + $0x38] sm:$0xff] }
   0x7   :  { %582 = vmatpush.msra.mxu2 %v49_v5  ;;  %583 = vmatpush.msra.mxu3 %v49_v5  ;;  %v35_v17 = vld [vmem:[%s1039_s1 + $0x68] sm:$0xff]  ;;  %v253_v19 = vld [vmem:[%s1037_s3 + $0x40] sm:$0xff]  ;;  %v251_v21 = vld [vmem:[%s1037_s3 + $0x30] sm:$0xff] }
   0x8   :  { %141 = vmatpush.msra.mxu0 %v48_v6  ;;  %584 = vmatpush.msra.mxu1 %v48_v6  ;;  %v24_v22 = vld [vmem:[%s1039_s1 + $0x10] sm:$0xff]  ;;  %v30_v23 = vld [vmem:[%s1039_s1 + $0x40] sm:$0xff]  ;;  %v43_v25 = vld [vmem:[%s1039_s1 + $0xa8] sm:$0xff] }
   0x9   :  { %585 = vmatpush.msra.mxu2 %v48_v6  ;;  %586 = vmatpush.msra.mxu3 %v48_v6  ;;  %v36_v24 = vld [vmem:[%s1039_s1 + $0x70] sm:$0xff]  ;;  %v256_v26 = vld [vmem:[%s1037_s3 + $0x58] sm:$0xff]  ;;  %v254_v28 = vld [vmem:[%s1037_s3 + $0x48] sm:$0xff] }
   0xa   :  { %142 = vmatpush.msra.mxu0 %v47_v7  ;;  %587 = vmatpush.msra.mxu1 %v47_v7  ;;  %v255_v27 = vld [vmem:[%s1037_s3 + $0x50] sm:$0xff]  ;;  %v25_v29 = vld [vmem:[%s1039_s1 + $0x18] sm:$0xff]  ;;  %v31_v30 = vld [vmem:[%s1039_s1 + $0x48] sm:$0xff] }
   0xb   :  { %588 = vmatpush.msra.mxu2 %v47_v7  ;;  %589 = vmatpush.msra.mxu3 %v47_v7  ;;  %v37_v31 = vld [vmem:[%s1039_s1 + $0x78] sm:$0xff]  ;;  %v44_v32 = vld [vmem:[%s1039_s1 + $0xb0] sm:$0xff]  ;;  %v258_v34 = vld [vmem:[%s1037_s3 + $0x68] sm:$0xff] }
   0xc   :  { %553 = vmatmul.msk.f32.vlgmr.msra.gmra.mxu0 %vm51_vm0, %v22_v8  ;;  %559 = vmatmul.msk.f32.vlgmr.msra.gmra.mxu1 %vm51_vm0, %v28_v9  ;;  %v259_v33 = vld [vmem:[%s1037_s3 + $0x70] sm:$0xff]  ;;  %v257_v35 = vld [vmem:[%s1037_s3 + $0x60] sm:$0xff]  ;;  %v45_v39 = vld [vmem:[%s1039_s1 + $0xb8] sm:$0xff] }
   0xd   :  { %565 = vmatmul.msk.f32.vlgmr.msra.gmra.mxu2 %vm51_vm0, %v34_v10  ;;  %572 = vmatmul.msk.f32.vlgmr.msra.gmra.mxu3 %vm51_vm0, %v41_v11  ;;  %v26_v36 = vld [vmem:[%s1039_s1 + $0x20] sm:$0xff]  ;;  %v32_v37 = vld [vmem:[%s1039_s1 + $0x50] sm:$0xff]  ;;  %v262_v40 = vld [vmem:[%s1037_s3 + $0x88] sm:$0xff] }
   0xe   :  { %297 = vperm.xlu2 %593, %v250_v12   ;;  %287 = vperm.xlu1 %592, %v248_v13   ;;  %v38_v38 = vld [vmem:[%s1039_s1 + $0x80] sm:$0xff]  ;;  %v260_v42 = vld [vmem:[%s1037_s3 + $0x78] sm:$0xff]  ;;  %v27_v43 = vld [vmem:[%s1039_s1 + $0x28] sm:$0xff] }
   0xf   :  { %277 = vperm.xlu0 %591, %v246_v14   ;;  %v261_v41 = vld [vmem:[%s1037_s3 + $0x80] sm:$0xff]  ;;  %v33_v44 = vld [vmem:[%s1039_s1 + $0x58] sm:$0xff]  ;;  %v39_v45 = vld [vmem:[%s1039_s1 + $0x88] sm:$0xff] }
  0x10   :  { %v46_v46 = vld [vmem:[%s1039_s1 + $0xc0] sm:$0xff]  ;;  %v264_v48 = vld [vmem:[%s1037_s3 + $0x98] sm:$0xff]  ;;  %v263_v49 = vld [vmem:[%s1037_s3 + $0x90] sm:$0xff] }
  0x11   :  { %v265_v47 = vld [vmem:[%s1037_s3 + $0xa0] sm:$0xff]  ;;  %v40_v50 = vld [vmem:[%s1039_s1 + $0x90] sm:$0xff]  ;;  %v268_v51 = vld [vmem:[%s1037_s3 + $0xb8] sm:$0xff] }
  0x12   :  { %v267_v52 = vld [vmem:[%s1037_s3 + $0xb0] sm:$0xff]  ;;  %v266_v53 = vld [vmem:[%s1037_s3 + $0xa8] sm:$0xff]  ;;  %v269_v54 = vld [vmem:[%s1037_s3 + $0xc0] sm:$0xff] }
  0x13   :  { %v886_v5 = vld [vmem:[%s1040_s4] ss:$0 sm:$0xff] }
  0x14   :  { %554 = vmatmul.msk.f32.gmra.mxu0 %vm51_vm0, %v23_v15  ;;  %560 = vmatmul.msk.f32.gmra.mxu1 %vm51_vm0, %v29_v16 }
  0x15   :  { %566 = vmatmul.msk.f32.gmra.mxu2 %vm51_vm0, %v35_v17  ;;  %573 = vmatmul.msk.f32.gmra.mxu3 %vm51_vm0, %v42_v18 }
  0x16   :  { %312 = vperm.xlu2 %593, %v253_v19   ;;  %307 = vperm.xlu1 %592, %v252_v20  }
  0x17   :  { %302 = vperm.xlu0 %591, %v251_v21  }
  0x1c   :  { %555 = vmatmul.msk.f32.gmra.mxu0 %vm51_vm0, %v24_v22  ;;  %561 = vmatmul.msk.f32.gmra.mxu1 %vm51_vm0, %v30_v23 }
  0x1d   :  { %567 = vmatmul.msk.f32.gmra.mxu2 %vm51_vm0, %v36_v24  ;;  %574 = vmatmul.msk.f32.gmra.mxu3 %vm51_vm0, %v43_v25 }
  0x1e   :  { %327 = vperm.xlu2 %593, %v256_v26   ;;  %322 = vperm.xlu1 %592, %v255_v27  }
  0x1f   :  { %317 = vperm.xlu0 %591, %v254_v28  }
  0x24   :  { %556 = vmatmul.msk.f32.gmra.mxu0 %vm51_vm0, %v25_v29  ;;  %562 = vmatmul.msk.f32.gmra.mxu1 %vm51_vm0, %v31_v30 }
  0x25   :  { %568 = vmatmul.msk.f32.gmra.mxu2 %vm51_vm0, %v37_v31  ;;  %575 = vmatmul.msk.f32.gmra.mxu3 %vm51_vm0, %v44_v32 }
  0x26   :  { %342 = vperm.xlu2 %593, %v259_v33   ;;  %337 = vperm.xlu1 %592, %v258_v34  }
  0x27   :  { %332 = vperm.xlu0 %591, %v257_v35  }
  0x2c   :  { %557 = vmatmul.msk.f32.gmra.mxu0 %vm51_vm0, %v26_v36  ;;  %563 = vmatmul.msk.f32.gmra.mxu1 %vm51_vm0, %v32_v37 }
  0x2d   :  { %569 = vmatmul.msk.f32.gmra.mxu2 %vm51_vm0, %v38_v38  ;;  %576 = vmatmul.msk.f32.gmra.mxu3 %vm51_vm0, %v45_v39 }
  0x2e   :  { %357 = vperm.xlu2 %593, %v262_v40   ;;  %352 = vperm.xlu1 %592, %v261_v41  }
  0x2f   :  { %347 = vperm.xlu0 %591, %v260_v42  }
  0x34   :  { %558 = vmatmul.msk.f32.gmra.mxu0 %vm51_vm0, %v27_v43  ;;  %564 = vmatmul.msk.f32.gmra.mxu1 %vm51_vm0, %v33_v44 }
  0x35   :  { %570 = vmatmul.msk.f32.gmra.mxu2 %vm51_vm0, %v39_v45  ;;  %577 = vmatmul.msk.f32.gmra.mxu3 %vm51_vm0, %v46_v46 }
  0x36   :  { %372 = vperm.xlu2 %593, %v265_v47   ;;  %367 = vperm.xlu1 %592, %v264_v48  }
  0x37   :  { %362 = vperm.xlu0 %591, %v263_v49  }
  0x3d   :  { %571 = vmatmul.msk.f32.gmra.mxu2 %vm51_vm0, %v40_v50 }
  0x3e   :  { %387 = vperm.xlu2 %593, %v268_v51   ;;  %382 = vperm.xlu1 %592, %v267_v52  }
  0x3f   :  { %377 = vperm.xlu0 %591, %v266_v53  }
  0x47   :  { %392 = vperm.xlu0 %591, %v269_v54  }
  0x5c   :  { %v863_v55 = vpop.permute.xlu2 %292 }
  0x68   :  { %v865_v56 = vpop.permute.xlu2 %297 }
  0x70   :  { %v867_v57 = vpop.permute.xlu2 %312 }
  0x75   :  { %v869_v58 = vpop.permute.xlu1 %282  ;;  %v273_v59 = vpop.permute.xlu0 %272 }
  0x78   :  { %v871_v60 = vpop.permute.xlu2 %327 }
  0x80   :  { %v873_v61 = vpop.permute.xlu1 %287  ;;  %v875_v63 = vpop.permute.xlu2 %342 }
  0x81   :  { %v278_v62 = vpop.permute.xlu0 %277 }
  0x88   :  { %v308_v1 = vpop.permute.xlu1 %307  ;;  %v891_v12 = vpop.permute.xlu2 %357 }
  0x89   :  { %v303_v2 = vpop.permute.xlu0 %302  ;;  %v144_v3 = vpop.f32.mrf.mxu0 }
  0x8a   :  { %v220_v4 = vmul.f32 %v880_v0, %v144_v3  ;;  %v162_v6 = vpop.f32.mrf.mxu1 }
  0x8b   :  { %v226_v7 = vmul.f32 %v880_v0, %v162_v6 }
  0x8c   :  { %v395_v8 = vadd.f32 %v273_v59, %v220_v4 }
  0x8d   :  { %v401_v9 = vadd.f32 %v303_v2, %v226_v7 }
  0x8e   :  { %v424_v10 = vadd.f32 %v886_v5, %v395_v8 }
  0x8f   :  { %v430_v11 = vadd.f32 %v886_v5, %v401_v9 }
  0x90   :  { %v449_v13 = vmin.f32 %v424_v10, 0.0  ;;  %v893_v14 = vpop.permute.xlu1 %322  ;;  %v180_v17 = vpop.f32.mrf.mxu2 }
  0x91   :  { %v455_v15 = vmin.f32 %v430_v11, 0.0  ;;  %v895_v16 = vpop.permute.xlu0 %317  ;;  %v897_v19 = vpop.f32.mrf.mxu3  ;;  %v232_v28 = vmul.f32 %v880_v0, %v180_v17 }
  0x92   :  { %v474_v18 = vmul.f32 1.442695, %v449_v13  ;;  %v147_v20 = vpop.f32.mrf.mxu0  ;;  %v165_v23 = vpop.f32.mrf.mxu1 }
  0x93   :  { %v486_v21 = vmul.f32 1.442695, %v455_v15  ;;  %v221_v22 = vmul.f32 %v880_v0, %v147_v20  ;;  %v227_v24 = vmul.f32 %v880_v0, %v165_v23  ;;  %v373_v45 = vpop.permute.xlu2 %372 }
  0x94   :  { %595 = vpow2.f32 %v474_v18 }
  0x95   :  { %597 = vpow2.f32 %v486_v21  ;;  %v396_v25 = vadd.f32 %v278_v62, %v221_v22  ;;  %v402_v26 = vadd.f32 %v308_v1, %v227_v24 }
  0x97   :  { %v425_v27 = vadd.f32 %v886_v5, %v396_v25  ;;  %v431_v29 = vadd.f32 %v886_v5, %v402_v26 }
  0x98   :  { %v338_v30 = vpop.permute.xlu1 %337  ;;  %v183_v33 = vpop.f32.mrf.mxu2 }
  0x99   :  { %v450_v31 = vmin.f32 %v425_v27, 0.0  ;;  %v333_v32 = vpop.permute.xlu0 %332  ;;  %v456_v35 = vmin.f32 %v431_v29, 0.0  ;;  %v233_v37 = vmul.f32 %v880_v0, %v183_v33  ;;  %v204_v38 = vpop.f32.mrf.mxu3  ;;  %v239_v29 = vmul.f32 %v880_v0, %v897_v19 }
  0x9a   :  { %v596_v34 = vpop.eup %595  ;;  %v407_v36 = vadd.f32 %v333_v32, %v232_v28  ;;  %v150_v39 = vpop.f32.mrf.mxu0  ;;  %v240_v42 = vmul.f32 %v880_v0, %v204_v38 }
  0x9b   :  { %v598_v40 = vpop.eup %597  ;;  %524 = vst [vmem:[%s1042_s5] sm:$0xff] %v596_v34  ;;  %v476_v41 = vmul.f32 1.442695, %v450_v31  ;;  %v222_v43 = vmul.f32 %v880_v0, %v150_v39  ;;  %v168_v44 = vpop.f32.mrf.mxu1  ;;  %v488_v46 = vmul.f32 1.442695, %v456_v35  ;;  %v408_v48 = vadd.f32 %v338_v30, %v233_v37 }
  0x9c   :  { %530 = vst [vmem:[%s1042_s5 + $0x30] sm:$0xff] %v598_v40  ;;  %v436_v47 = vadd.f32 %v886_v5, %v407_v36  ;;  %v228_v49 = vmul.f32 %v880_v0, %v168_v44  ;;  %v415_v50 = vadd.f32 %v373_v45, %v240_v42 }
  0x9d   :  { %599 = vpow2.f32 %v476_v41  ;;  %v397_v51 = vadd.f32 %v869_v58, %v222_v43  ;;  %v437_v53 = vadd.f32 %v886_v5, %v408_v48 }
  0x9e   :  { %601 = vpow2.f32 %v488_v46  ;;  %v461_v52 = vmin.f32 %v436_v47, 0.0  ;;  %v403_v54 = vadd.f32 %v867_v57, %v228_v49  ;;  %v444_v59 = vadd.f32 %v886_v5, %v415_v50 }
  0x9f   :  { %v426_v62 = vadd.f32 %v886_v5, %v397_v51  ;;  %v462_v2 = vmin.f32 %v437_v53, 0.0 }
  0xa0   :  { %v498_v1 = vmul.f32 1.442695, %v461_v52  ;;  %v432_v3 = vadd.f32 %v886_v5, %v403_v54  ;;  %v921_v4 = vpop.permute.xlu1 %352  ;;  %v469_v6 = vmin.f32 %v444_v59, 0.0  ;;  %v186_v58 = vpop.f32.mrf.mxu2 }
  0xa1   :  { %v451_v7 = vmin.f32 %v426_v62, 0.0  ;;  %v348_v8 = vpop.permute.xlu0 %347  ;;  %v500_v9 = vmul.f32 1.442695, %v462_v2  ;;  %v234_v11 = vmul.f32 %v880_v0, %v186_v58  ;;  %v207_v57 = vpop.f32.mrf.mxu3 }
  0xa2   :  { %603 = vpow2.f32 %v498_v1  ;;  %v457_v10 = vmin.f32 %v432_v3, 0.0  ;;  %v153_v13 = vpop.f32.mrf.mxu0  ;;  %v514_v17 = vmul.f32 1.442695, %v469_v6  ;;  %v241_v2 = vmul.f32 %v880_v0, %v207_v57 }
  0xa3   :  { %v600_v15 = vpop.eup %599  ;;  %v478_v18 = vmul.f32 1.442695, %v451_v7  ;;  %v223_v20 = vmul.f32 %v880_v0, %v153_v13  ;;  %v171_v21 = vpop.f32.mrf.mxu1  ;;  %605 = vpow2.f32 %v500_v9  ;;  %v409_v24 = vadd.f32 %v875_v63, %v234_v11 }
  0xa4   :  { %v602_v22 = vpop.eup %601  ;;  %525 = vst [vmem:[%s1042_s5 + $0x8] sm:$0xff] %v600_v15  ;;  %v490_v23 = vmul.f32 1.442695, %v457_v10  ;;  %v229_v25 = vmul.f32 %v880_v0, %v171_v21  ;;  %607 = vpow2.f32 %v514_v17 }
  0xa5   :  { %531 = vst [vmem:[%s1042_s5 + $0x38] sm:$0xff] %v602_v22  ;;  %v398_v26 = vadd.f32 %v873_v61, %v223_v20  ;;  %609 = vpow2.f32 %v478_v18  ;;  %v438_v27 = vadd.f32 %v886_v5, %v409_v24 }
  0xa6   :  { %v404_v28 = vadd.f32 %v895_v16, %v229_v25  ;;  %611 = vpow2.f32 %v490_v23 }
  0xa7   :  { %v427_v63 = vadd.f32 %v886_v5, %v398_v26  ;;  %v463_v31 = vmin.f32 %v438_v27, 0.0  ;;  %v388_v26 = vpop.permute.xlu2 %387 }
  0xa8   :  { %v604_v30 = vpop.eup %603  ;;  %v433_v32 = vadd.f32 %v886_v5, %v404_v28  ;;  %v368_v33 = vpop.permute.xlu1 %367 }
  0xa9   :  { %536 = vst [vmem:[%s1042_s5 + $0x60] sm:$0xff] %v604_v30  ;;  %v452_v61 = vmin.f32 %v427_v63, 0.0  ;;  %v414_v34 = vadd.f32 %v368_v33, %v239_v29  ;;  %v943_v35 = vpop.permute.xlu0 %362  ;;  %v189_v16 = vpop.f32.mrf.mxu2  ;;  %v502_v37 = vmul.f32 1.442695, %v463_v31 }
  0xaa   :  { %v606_v36 = vpop.eup %605  ;;  %v458_v19 = vmin.f32 %v433_v32, 0.0  ;;  %v235_v38 = vmul.f32 %v880_v0, %v189_v16  ;;  %v210_v39 = vpop.f32.mrf.mxu3 }
  0xab   :  { %v156_v40 = vpop.f32.mrf.mxu0  ;;  %v608_v41 = vpop.eup %607  ;;  %537 = vst [vmem:[%s1042_s5 + $0x68] sm:$0xff] %v606_v36  ;;  %v480_v42 = vmul.f32 1.442695, %v452_v61  ;;  %v443_v43 = vadd.f32 %v886_v5, %v414_v34  ;;  %613 = vpow2.f32 %v502_v37  ;;  %v242_v52 = vmul.f32 %v880_v0, %v210_v39 }
  0xac   :  { %v224_v44 = vmul.f32 %v880_v0, %v156_v40  ;;  %v174_v45 = vpop.f32.mrf.mxu1  ;;  %v610_v46 = vpop.eup %609  ;;  %544 = vst [vmem:[%s1042_s5 + $0xa0] sm:$0xff] %v608_v41  ;;  %v492_v47 = vmul.f32 1.442695, %v458_v19  ;;  %v410_v48 = vadd.f32 %v348_v8, %v235_v38 }
  0xad   :  { %v230_v49 = vmul.f32 %v880_v0, %v174_v45  ;;  %v612_v50 = vpop.eup %611  ;;  %526 = vst [vmem:[%s1042_s5 + $0x10] sm:$0xff] %v610_v46  ;;  %615 = vpow2.f32 %v480_v42  ;;  %v468_v51 = vmin.f32 %v443_v43, 0.0 }
  0xae   :  { %v399_v53 = vadd.f32 %v863_v55, %v224_v44  ;;  %532 = vst [vmem:[%s1042_s5 + $0x40] sm:$0xff] %v612_v50  ;;  %617 = vpow2.f32 %v492_v47  ;;  %v439_v54 = vadd.f32 %v886_v5, %v410_v48 }
  0xaf   :  { %v405_v59 = vadd.f32 %v893_v14, %v230_v49  ;;  %v512_v62 = vmul.f32 1.442695, %v468_v51 }
  0xb0   :  { %v428_v1 = vadd.f32 %v886_v5, %v399_v53  ;;  %v464_v3 = vmin.f32 %v439_v54, 0.0  ;;  %v383_v7 = vpop.permute.xlu1 %382 }
  0xb1   :  { %v434_v6 = vadd.f32 %v886_v5, %v405_v59  ;;  %619 = vpow2.f32 %v512_v62  ;;  %v417_v8 = vadd.f32 %v383_v7, %v242_v52  ;;  %v378_v58 = vpop.permute.xlu0 %377  ;;  %v192_v9 = vpop.f32.mrf.mxu2 }
  0xb2   :  { %v453_v55 = vmin.f32 %v428_v1, 0.0  ;;  %v614_v10 = vpop.eup %613  ;;  %v504_v11 = vmul.f32 1.442695, %v464_v3  ;;  %v416_v15 = vadd.f32 %v378_v58, %v241_v2  ;;  %v236_v14 = vmul.f32 %v880_v0, %v192_v9  ;;  %v213_v17 = vpop.f32.mrf.mxu3 }
  0xb3   :  { %v459_v13 = vmin.f32 %v434_v6, 0.0  ;;  %v159_v18 = vpop.f32.mrf.mxu0  ;;  %v616_v20 = vpop.eup %615  ;;  %538 = vst [vmem:[%s1042_s5 + $0x70] sm:$0xff] %v614_v10  ;;  %v446_v21 = vadd.f32 %v886_v5, %v417_v8  ;;  %v243_v22 = vmul.f32 %v880_v0, %v213_v17 }
  0xb4   :  { %v482_v57 = vmul.f32 1.442695, %v453_v55  ;;  %v225_v23 = vmul.f32 %v880_v0, %v159_v18  ;;  %v177_v24 = vpop.f32.mrf.mxu1  ;;  %v618_v25 = vpop.eup %617  ;;  %527 = vst [vmem:[%s1042_s5 + $0x18] sm:$0xff] %v616_v20  ;;  %621 = vpow2.f32 %v504_v11  ;;  %v445_v28 = vadd.f32 %v886_v5, %v416_v15 }
  0xb5   :  { %v494_v27 = vmul.f32 1.442695, %v459_v13  ;;  %v411_v29 = vadd.f32 %v921_v4, %v236_v14  ;;  %533 = vst [vmem:[%s1042_s5 + $0x48] sm:$0xff] %v618_v25  ;;  %v471_v63 = vmin.f32 %v446_v21, 0.0  ;;  %v418_v30 = vadd.f32 %v388_v26, %v243_v22 }
  0xb6   :  { %623 = vpow2.f32 %v482_v57  ;;  %v400_v31 = vadd.f32 %v865_v56, %v225_v23  ;;  %v470_v32 = vmin.f32 %v445_v28, 0.0  ;;  %v231_v61 = vmul.f32 %v880_v0, %v177_v24 }
  0xb7   :  { %625 = vpow2.f32 %v494_v27  ;;  %v440_v33 = vadd.f32 %v886_v5, %v411_v29  ;;  %v620_v34 = vpop.eup %619  ;;  %v518_v16 = vmul.f32 1.442695, %v471_v63  ;;  %v447_v36 = vadd.f32 %v886_v5, %v418_v30 }
  0xb8   :  { %v429_v4 = vadd.f32 %v886_v5, %v400_v31  ;;  %543 = vst [vmem:[%s1042_s5 + $0x98] sm:$0xff] %v620_v34  ;;  %v516_v37 = vmul.f32 1.442695, %v470_v32  ;;  %v406_v56 = vadd.f32 %v871_v60, %v231_v61 }
  0xb9   :  { %v465_v19 = vmin.f32 %v440_v33, 0.0  ;;  %627 = vpow2.f32 %v518_v16  ;;  %v472_v38 = vmin.f32 %v447_v36, 0.0  ;;  %v195_v40 = vpop.f32.mrf.mxu2  ;;  %v393_v51 = vpop.permute.xlu0 %392 }
  0xba   :  { %v454_v39 = vmin.f32 %v429_v4, 0.0  ;;  %v622_v41 = vpop.eup %621  ;;  %629 = vpow2.f32 %v516_v37  ;;  %v435_v43 = vadd.f32 %v886_v5, %v406_v56  ;;  %v237_v44 = vmul.f32 %v880_v0, %v195_v40  ;;  %v216_v45 = vpop.f32.mrf.mxu3 }
  0xbb   :  { %v506_v42 = vmul.f32 1.442695, %v465_v19  ;;  %539 = vst [vmem:[%s1042_s5 + $0x78] sm:$0xff] %v622_v41  ;;  %v520_v47 = vmul.f32 1.442695, %v472_v38  ;;  %v244_v60 = vmul.f32 %v880_v0, %v216_v45 }
  0xbc   :  { %v624_v46 = vpop.eup %623  ;;  %v484_v48 = vmul.f32 1.442695, %v454_v39  ;;  %v460_v50 = vmin.f32 %v435_v43, 0.0  ;;  %v412_v52 = vadd.f32 %v891_v12, %v237_v44 }
  0xbd   :  { %v626_v49 = vpop.eup %625  ;;  %528 = vst [vmem:[%s1042_s5 + $0x20] sm:$0xff] %v624_v46  ;;  %631 = vpow2.f32 %v506_v42  ;;  %v419_v53 = vadd.f32 %v393_v51, %v244_v60 }
  0xbe   :  { %534 = vst [vmem:[%s1042_s5 + $0x50] sm:$0xff] %v626_v49  ;;  %633 = vpow2.f32 %v520_v47  ;;  %v496_v54 = vmul.f32 1.442695, %v460_v50  ;;  %v441_v59 = vadd.f32 %v886_v5, %v412_v52 }
  0xbf   :  { %635 = vpow2.f32 %v484_v48  ;;  %v628_v62 = vpop.eup %627  ;;  %v448_v1 = vadd.f32 %v886_v5, %v419_v53 }
  0xc0   :  { %v630_v2 = vpop.eup %629  ;;  %546 = vst [vmem:[%s1042_s5 + $0xb0] sm:$0xff] %v628_v62  ;;  %637 = vpow2.f32 %v496_v54  ;;  %v466_v12 = vmin.f32 %v441_v59, 0.0 }
  0xc1   :  { %545 = vst [vmem:[%s1042_s5 + $0xa8] sm:$0xff] %v630_v2  ;;  %v473_v3 = vmin.f32 %v448_v1, 0.0  ;;  %v198_v6 = vpop.f32.mrf.mxu2 }
  0xc2   :  { %v508_v55 = vmul.f32 1.442695, %v466_v12  ;;  %v238_v8 = vmul.f32 %v880_v0, %v198_v6 }
  0xc3   :  { %v632_v7 = vpop.eup %631  ;;  %v522_v9 = vmul.f32 1.442695, %v473_v3 }
  0xc4   :  { %v634_v58 = vpop.eup %633  ;;  %540 = vst [vmem:[%s1042_s5 + $0x80] sm:$0xff] %v632_v7  ;;  %639 = vpow2.f32 %v508_v55  ;;  %v413_v11 = vadd.f32 %v943_v35, %v238_v8 }
  0xc5   :  { %v636_v10 = vpop.eup %635  ;;  %547 = vst [vmem:[%s1042_s5 + $0xb8] sm:$0xff] %v634_v58  ;;  %641 = vpow2.f32 %v522_v9 }
  0xc6   :  { %529 = vst [vmem:[%s1042_s5 + $0x28] sm:$0xff] %v636_v10  ;;  %v638_v0 = vpop.eup %637  ;;  %v442_v13 = vadd.f32 %v886_v5, %v413_v11 }
  0xc7   :  { %535 = vst [vmem:[%s1042_s5 + $0x58] sm:$0xff] %v638_v0 }
  0xc8   :  { %v467_v15 = vmin.f32 %v442_v13, 0.0 }
  0xca   :  { %v640_v14 = vpop.eup %639  ;;  %v510_v17 = vmul.f32 1.442695, %v467_v15 }
  0xcb   :  { %v642_v18 = vpop.eup %641  ;;  %541 = vst [vmem:[%s1042_s5 + $0x88] sm:$0xff] %v640_v14 }
  0xcc   :  { %548 = vst [vmem:[%s1042_s5 + $0xc0] sm:$0xff] %v642_v18  ;;  %643 = vpow2.f32 %v510_v17 }
  0xd2   :  { %v644_v35 = vpop.eup %643 }
  0xd3   :  { %542 = vst [vmem:[%s1042_s5 + $0x90] sm:$0xff] %v644_v35 }

</bundles_post_ra>
